<compile_context>
chip_gen: v7x
topology: tpu7x:2x2x1
jax: 0.10.0
libtpu: 0.0.40
codegen_flags: <defaults>
</compile_context>

<pallas_src>
import jax
import jax.numpy as jnp
from jax.experimental import pallas as pl
from jax.experimental.pallas import tpu as pltpu

_MIB = 1024 * 1024


def _round_down8(a):
    return max(8, (a // 8) * 8)


def _choose_pack(n, c, l_max=512):
    """Largest p with (p*c) % 128 == 0, p*c <= l_max and n % p == 0 (lane-dense, copy-free)."""
    for p in range(max(1, l_max // c), 0, -1):
        if (p * c) % 128 == 0 and n % p == 0:
            return p
    return 1  # masked-lane fallback (still copy-free, still correct)


# ---------------------------- resident fused single-pass path ----------------------------

def _make_resident_kernel(inv_n, pack, c):
    def kernel(x_ref, w1_ref, b1_ref, w2_ref, b2_ref, o_ref):
        x = x_ref[...]                                   # [rows, L] — whole array resident
        col = jnp.sum(x, axis=0, keepdims=True)          # [1, L] column sums
        ch = col[:, 0:c]
        for p in range(1, pack):                         # fold packed lanes -> per-channel sums
            ch = ch + col[:, p * c:(p + 1) * c]
        mean = ch * inv_n                                 # divide by TRUE N
        # Excitation: fc1 -> ReLU -> fc2 -> sigmoid (one-row matmuls, negligible cost).
        h = jnp.dot(mean, w1_ref[...], preferred_element_type=jnp.float32) + b1_ref[...]
        h = jnp.maximum(h, 0.0)
        g = jnp.dot(h, w2_ref[...], preferred_element_type=jnp.float32) + b2_ref[...]
        g = jax.nn.sigmoid(g)                             # [1, C]
        gate = jnp.tile(g, (1, pack))                     # [1, L] lane-dense gate
        o_ref[...] = x * gate
    return kernel


# ---------------------------- streaming two-pass path ----------------------------

def _make_reduce_kernel(rows_packed, tiles_per_slice, tile):
    def kernel(x_ref, psum_ref):
        s = pl.program_id(0)           # slice axis ("parallel": split across TCs on v7x)
        i = pl.program_id(1)           # tile axis  ("arbitrary": resident accumulator)

        @pl.when(i == 0)
        def _():
            psum_ref[...] = jnp.zeros_like(psum_ref)

        xt = x_ref[...]                                        # [tile, L]
        t_idx = s * tiles_per_slice + i                        # logical (unclamped) tile index
        row0 = t_idx * tile
        row_ids = jax.lax.broadcasted_iota(jnp.int32, (tile, 1), 0) + row0
        xt = jnp.where(row_ids < rows_packed, xt, 0.0)         # mask ragged / out-of-range rows
        # VPU partial accumulation: fold the tile's rows into 8 sublanes (no big XLU reduce).
        part = jnp.sum(xt.reshape(tile // 8, 8, xt.shape[-1]), axis=0)   # [8, L]
        psum_ref[...] += part[None]
    return kernel


def _scale_kernel(x_ref, g_ref, o_ref):
    # HBM-bound elementwise scale: [tile, L] * [1, L] broadcast.
    o_ref[...] = x_ref[...] * g_ref[...]


# ---------------------------- wrapper ----------------------------

def senet_forward(x, w1, b1, w2, b2, *, tile_rows=1024, resident_max_bytes=10 * _MIB):
    """SENet forward. x: [N, C] f32; w1: [C, H]; b1: [1, H]; w2: [H, C]; b2: [1, C]."""
    x = x.astype(jnp.float32)
    N, C = x.shape
    H = w1.shape[1]
    inv_n = 1.0 / float(N)

    pack = _choose_pack(N, C)
    L = pack * C
    rows = N // pack                       # exact: pack divides N by construction
    xp = x.reshape(rows, L)                # free full-buffer reshape (no copy)
    x_bytes = N * C * x.dtype.itemsize

    # ---------------- resident fused single-pass ----------------
    if x_bytes <= resident_max_bytes or rows < 8:
        outp = pl.pallas_call(
            _make_resident_kernel(inv_n, pack, C),
            out_shape=jax.ShapeDtypeStruct((rows, L), jnp.float32),
            grid=(1,),
            in_specs=[
                pl.BlockSpec((rows, L), lambda i: (0, 0)),
                pl.BlockSpec((C, H), lambda i: (0, 0)),
                pl.BlockSpec((1, H), lambda i: (0, 0)),
                pl.BlockSpec((H, C), lambda i: (0, 0)),
                pl.BlockSpec((1, C), lambda i: (0, 0)),
            ],
            out_specs=pl.BlockSpec((rows, L), lambda i: (0, 0)),
            compiler_params=pltpu.CompilerParams(
                dimension_semantics=("arbitrary",),
                vmem_limit_bytes=48 * _MIB),    # explicit: v7x-safe, raises v5e/v6e default
        )(xp, w1, b1, w2, b2)
        return outp.reshape(N, C)

    # ---------------- streaming two-pass ----------------
    tile = min(_round_down8(tile_rows), _round_down8(rows))
    num_tiles = pl.cdiv(rows, tile)
    n_slices = 2                                    # both TCs on v7x; harmless on v5e/v6e
    tps = pl.cdiv(num_tiles, n_slices)

    # Phase 1: streamed column-sum partials, per slice.  Block indices past the last
    # valid tile are clamped; their rows are masked out inside the kernel.
    psum = pl.pallas_call(
        _make_reduce_kernel(rows, tps, tile),
        out_shape=jax.ShapeDtypeStruct((n_slices, 8, L), jnp.float32),
        grid=(n_slices, tps),
        in_specs=[pl.BlockSpec(
            (tile, L), lambda s, i: (jnp.minimum(s * tps + i, num_tiles - 1), 0))],
        out_specs=pl.BlockSpec((1, 8, L), lambda s, i: (s, 0, 0)),
        compiler_params=pltpu.CompilerParams(
            dimension_semantics=("parallel", "arbitrary"),
            vmem_limit_bytes=32 * _MIB),
        cost_estimate=pl.CostEstimate(flops=rows * L, transcendentals=0,
                                      bytes_accessed=rows * L * 4),
    )(xp)

    # Excitation MLP hoisted to plain JAX (tiny [1, C] work — not worth a kernel stream).
    col = jnp.sum(psum, axis=(0, 1))                       # [L]
    ch = jnp.sum(col.reshape(pack, C), axis=0)             # [C]  (lane j holds channel j % C)
    mean = (ch * inv_n)[None, :]                            # [1, C]
    h = jnp.maximum(mean @ w1 + b1, 0.0)
    gate_c = jax.nn.sigmoid(h @ w2 + b2)                    # [1, C]
    gate = jnp.tile(gate_c, (1, pack))                      # [1, L] lane-dense gate

    # Phase 2: tiled, double-buffered scale; tile axis is parallel (megacore on v7x).
    # Out-of-bounds rows of the last block are dropped on writeback — no output slice.
    outp = pl.pallas_call(
        _scale_kernel,
        out_shape=jax.ShapeDtypeStruct((rows, L), jnp.float32),
        grid=(num_tiles,),
        in_specs=[
            pl.BlockSpec((tile, L), lambda i: (i, 0)),
            pl.BlockSpec((1, L), lambda i: (0, 0)),
        ],
        out_specs=pl.BlockSpec((tile, L), lambda i: (i, 0)),
        compiler_params=pltpu.CompilerParams(
            dimension_semantics=("parallel",),
            vmem_limit_bytes=32 * _MIB),
        cost_estimate=pl.CostEstimate(flops=rows * L, transcendentals=0,
                                      bytes_accessed=2 * rows * L * 4),
    )(xp, gate)
    return outp.reshape(N, C)


def senet_reference(x, w1, b1, w2, b2):
    mean = jnp.mean(x, axis=0, keepdims=True)
    h = jnp.maximum(mean @ w1 + b1, 0.0)
    g = jax.nn.sigmoid(h @ w2 + b2)
    return x * g


if __name__ == "__main__":
    key = jax.random.PRNGKey(0)

    # Shapes consistent with the module: N points, in_channel=C, reduction_ratio=4.
    C, reduction_ratio = 32, 4
    H = round(C / reduction_ratio)  # 8

    k1, k2, k3, k4, kx1, kx2, kx3, kx4 = jax.random.split(key, 8)

    # nn.Linear-style init (uniform +/- 1/sqrt(fan_in)), stored transposed [in, out].
    bound1 = 1.0 / jnp.sqrt(C)
    w1 = jax.random.uniform(k1, (C, H), jnp.float32, -bound1, bound1)
    b1 = jax.random.uniform(k2, (1, H), jnp.float32, -bound1, bound1)
    bound2 = 1.0 / jnp.sqrt(H)
    w2 = jax.random.uniform(k3, (H, C), jnp.float32, -bound2, bound2)
    b2 = jax.random.uniform(k4, (1, C), jnp.float32, -bound2, bound2)

    def check(x, **kw):
        out = jax.block_until_ready(senet_forward(x, w1, b1, w2, b2, **kw))
        ref = senet_reference(x, w1, b1, w2, b2)
        assert out.shape == x.shape
        assert jnp.allclose(out, ref, atol=1e-5, rtol=1e-5), (
            "mismatch vs reference N=%d kw=%s" % (x.shape[0], kw))

    # Resident fused path (small N; lane-dense pack=16 and pack=12 respectively).
    check(jax.random.normal(kx1, (16, C), dtype=jnp.float32))
    check(jax.random.normal(kx2, (300, C), dtype=jnp.float32))
    # pack=1 fallback (odd N: no lane-dense repack divides it) — still resident, still copy-free.
    check(jax.random.normal(kx3, (77, C), dtype=jnp.float32))
    # Forced streaming two-pass path: multi-tile reduce (2-slice grid, ragged tail mask)
    # + parallel scale with clipped last-block writes.
    x_big = jax.random.normal(kx4, (3000, C), dtype=jnp.float32)
    check(x_big, resident_max_bytes=0, tile_rows=64)
    check(x_big, resident_max_bytes=0)   # default tile_rows=1024 (tile capped to rows)

    print("KERNEL_OK")
</pallas_src>

<mosaic_0001>
module attributes {stable_mosaic.version = 11 : i64} {
  func.func @kernel(%arg0: i32, %arg1: memref<1x512xf32, #tpu.memory_space<vmem>>, %arg2: memref<32x8xf32, #tpu.memory_space<vmem>>, %arg3: memref<1x8xf32, #tpu.memory_space<vmem>>, %arg4: memref<8x32xf32, #tpu.memory_space<vmem>>, %arg5: memref<1x32xf32, #tpu.memory_space<vmem>>, %arg6: memref<1x512xf32, #tpu.memory_space<vmem>>) attributes {dimension_semantics = [#tpu.dimension_semantics<arbitrary>], iteration_bounds = array<i64: 1>, scalar_prefetch = 0 : i64, scratch_operands = 0 : i64, tpu.core_type = #tpu.core_type<tc>, window_params = [{pipeline_mode = #tpu.pipeline_mode<synchronous>, transform_indices = @transform_0, window_bounds = array<i64: 1, 512>}, {pipeline_mode = #tpu.pipeline_mode<synchronous>, transform_indices = @transform_1, window_bounds = array<i64: 32, 8>}, {pipeline_mode = #tpu.pipeline_mode<synchronous>, transform_indices = @transform_2, window_bounds = array<i64: 1, 8>}, {pipeline_mode = #tpu.pipeline_mode<synchronous>, transform_indices = @transform_3, window_bounds = array<i64: 8, 32>}, {pipeline_mode = #tpu.pipeline_mode<synchronous>, transform_indices = @transform_4, window_bounds = array<i64: 1, 32>}, {pipeline_mode = #tpu.pipeline_mode<synchronous>, transform_indices = @transform_5, window_bounds = array<i64: 1, 512>}]} {
    %c0 = arith.constant 0 : index
    %c0_0 = arith.constant 0 : index
    %0 = vector.load %arg1[%c0, %c0_0] : memref<1x512xf32, #tpu.memory_space<vmem>>, vector<1x512xf32>
    %cst = arith.constant dense<0.000000e+00> : vector<512xf32>
    %1 = vector.multi_reduction <add>, %0, %cst [0] : vector<1x512xf32> to vector<512xf32>
    %2 = vector.shape_cast %1 : vector<512xf32> to vector<1x512xf32>
    %3 = vector.extract_strided_slice %2 {offsets = [0, 0], sizes = [1, 32], strides = [1, 1]} : vector<1x512xf32> to vector<1x32xf32>
    %4 = vector.extract_strided_slice %2 {offsets = [0, 32], sizes = [1, 32], strides = [1, 1]} : vector<1x512xf32> to vector<1x32xf32>
    %5 = arith.addf %3, %4 : vector<1x32xf32>
    %6 = vector.extract_strided_slice %2 {offsets = [0, 64], sizes = [1, 32], strides = [1, 1]} : vector<1x512xf32> to vector<1x32xf32>
    %7 = arith.addf %5, %6 : vector<1x32xf32>
    %8 = vector.extract_strided_slice %2 {offsets = [0, 96], sizes = [1, 32], strides = [1, 1]} : vector<1x512xf32> to vector<1x32xf32>
    %9 = arith.addf %7, %8 : vector<1x32xf32>
    %10 = vector.extract_strided_slice %2 {offsets = [0, 128], sizes = [1, 32], strides = [1, 1]} : vector<1x512xf32> to vector<1x32xf32>
    %11 = arith.addf %9, %10 : vector<1x32xf32>
    %12 = vector.extract_strided_slice %2 {offsets = [0, 160], sizes = [1, 32], strides = [1, 1]} : vector<1x512xf32> to vector<1x32xf32>
    %13 = arith.addf %11, %12 : vector<1x32xf32>
    %14 = vector.extract_strided_slice %2 {offsets = [0, 192], sizes = [1, 32], strides = [1, 1]} : vector<1x512xf32> to vector<1x32xf32>
    %15 = arith.addf %13, %14 : vector<1x32xf32>
    %16 = vector.extract_strided_slice %2 {offsets = [0, 224], sizes = [1, 32], strides = [1, 1]} : vector<1x512xf32> to vector<1x32xf32>
    %17 = arith.addf %15, %16 : vector<1x32xf32>
    %18 = vector.extract_strided_slice %2 {offsets = [0, 256], sizes = [1, 32], strides = [1, 1]} : vector<1x512xf32> to vector<1x32xf32>
    %19 = arith.addf %17, %18 : vector<1x32xf32>
    %20 = vector.extract_strided_slice %2 {offsets = [0, 288], sizes = [1, 32], strides = [1, 1]} : vector<1x512xf32> to vector<1x32xf32>
    %21 = arith.addf %19, %20 : vector<1x32xf32>
    %22 = vector.extract_strided_slice %2 {offsets = [0, 320], sizes = [1, 32], strides = [1, 1]} : vector<1x512xf32> to vector<1x32xf32>
    %23 = arith.addf %21, %22 : vector<1x32xf32>
    %24 = vector.extract_strided_slice %2 {offsets = [0, 352], sizes = [1, 32], strides = [1, 1]} : vector<1x512xf32> to vector<1x32xf32>
    %25 = arith.addf %23, %24 : vector<1x32xf32>
    %26 = vector.extract_strided_slice %2 {offsets = [0, 384], sizes = [1, 32], strides = [1, 1]} : vector<1x512xf32> to vector<1x32xf32>
    %27 = arith.addf %25, %26 : vector<1x32xf32>
    %28 = vector.extract_strided_slice %2 {offsets = [0, 416], sizes = [1, 32], strides = [1, 1]} : vector<1x512xf32> to vector<1x32xf32>
    %29 = arith.addf %27, %28 : vector<1x32xf32>
    %30 = vector.extract_strided_slice %2 {offsets = [0, 448], sizes = [1, 32], strides = [1, 1]} : vector<1x512xf32> to vector<1x32xf32>
    %31 = arith.addf %29, %30 : vector<1x32xf32>
    %32 = vector.extract_strided_slice %2 {offsets = [0, 480], sizes = [1, 32], strides = [1, 1]} : vector<1x512xf32> to vector<1x32xf32>
    %33 = arith.addf %31, %32 : vector<1x32xf32>
    %cst_1 = arith.constant 6.250000e-02 : f32
    %34 = vector.broadcast %cst_1 : f32 to vector<1x32xf32>
    %35 = arith.mulf %33, %34 : vector<1x32xf32>
    %c0_2 = arith.constant 0 : index
    %c0_3 = arith.constant 0 : index
    %36 = vector.load %arg2[%c0_2, %c0_3] : memref<32x8xf32, #tpu.memory_space<vmem>>, vector<32x8xf32>
    %cst_4 = arith.constant dense<0.000000e+00> : vector<1x8xf32>
    %37 = tpu.matmul %35, %36, %cst_4 {dimension_numbers = #tpu.dot_dimension_numbers<[1], [0], [0], [1], [0, 0, 1, 1], [], []>} : vector<1x32xf32>, vector<32x8xf32>, vector<1x8xf32> -> vector<1x8xf32>
    %c0_5 = arith.constant 0 : index
    %c0_6 = arith.constant 0 : index
    %38 = vector.load %arg3[%c0_5, %c0_6] : memref<1x8xf32, #tpu.memory_space<vmem>>, vector<1x8xf32>
    %39 = arith.addf %37, %38 : vector<1x8xf32>
    %cst_7 = arith.constant 0.000000e+00 : f32
    %40 = vector.broadcast %cst_7 : f32 to vector<1x8xf32>
    %41 = arith.maximumf %39, %40 : vector<1x8xf32>
    %c0_8 = arith.constant 0 : index
    %c0_9 = arith.constant 0 : index
    %42 = vector.load %arg4[%c0_8, %c0_9] : memref<8x32xf32, #tpu.memory_space<vmem>>, vector<8x32xf32>
    %cst_10 = arith.constant dense<0.000000e+00> : vector<1x32xf32>
    %43 = tpu.matmul %41, %42, %cst_10 {dimension_numbers = #tpu.dot_dimension_numbers<[1], [0], [0], [1], [0, 0, 1, 1], [], []>} : vector<1x8xf32>, vector<8x32xf32>, vector<1x32xf32> -> vector<1x32xf32>
    %c0_11 = arith.constant 0 : index
    %c0_12 = arith.constant 0 : index
    %44 = vector.load %arg5[%c0_11, %c0_12] : memref<1x32xf32, #tpu.memory_space<vmem>>, vector<1x32xf32>
    %45 = arith.addf %43, %44 : vector<1x32xf32>
    %46 = arith.negf %45 : vector<1x32xf32>
    %47 = math.exp %46 : vector<1x32xf32>
    %cst_13 = arith.constant 1.000000e+00 : f32
    %48 = vector.broadcast %cst_13 : f32 to vector<1x32xf32>
    %49 = arith.addf %48, %47 : vector<1x32xf32>
    %50 = arith.divf %48, %49 : vector<1x32xf32>
    %51 = tpu.concatenate %50, %50, %50, %50, %50, %50, %50, %50, %50, %50, %50, %50, %50, %50, %50, %50 in 1 : vector<1x32xf32>, vector<1x32xf32>, vector<1x32xf32>, vector<1x32xf32>, vector<1x32xf32>, vector<1x32xf32>, vector<1x32xf32>, vector<1x32xf32>, vector<1x32xf32>, vector<1x32xf32>, vector<1x32xf32>, vector<1x32xf32>, vector<1x32xf32>, vector<1x32xf32>, vector<1x32xf32>, vector<1x32xf32> -> vector<1x512xf32>
    %52 = arith.mulf %0, %51 : vector<1x512xf32>
    %c0_14 = arith.constant 0 : index
    %c0_15 = arith.constant 0 : index
    %53 = vector.load %arg6[%c0_14, %c0_15] : memref<1x512xf32, #tpu.memory_space<vmem>>, vector<1x512xf32>
    tpu.vector_store %arg6[%c0_14, %c0_15], %52 {strides = array<i32>} : memref<1x512xf32, #tpu.memory_space<vmem>>, vector<1x512xf32>,
    return
  }
  func.func @transform_0(%arg0: i32) -> (i32, i32) {
    %c0_i32 = arith.constant 0 : i32
    %c0_i32_0 = arith.constant 0 : i32
    %c0_i32_1 = arith.constant 0 : i32
    return %c0_i32, %c0_i32_0 : i32, i32
  }
  func.func @transform_1(%arg0: i32) -> (i32, i32) {
    %c0_i32 = arith.constant 0 : i32
    %c0_i32_0 = arith.constant 0 : i32
    %c0_i32_1 = arith.constant 0 : i32
    return %c0_i32, %c0_i32_0 : i32, i32
  }
  func.func @transform_2(%arg0: i32) -> (i32, i32) {
    %c0_i32 = arith.constant 0 : i32
    %c0_i32_0 = arith.constant 0 : i32
    %c0_i32_1 = arith.constant 0 : i32
    return %c0_i32, %c0_i32_0 : i32, i32
  }
  func.func @transform_3(%arg0: i32) -> (i32, i32) {
    %c0_i32 = arith.constant 0 : i32
    %c0_i32_0 = arith.constant 0 : i32
    %c0_i32_1 = arith.constant 0 : i32
    return %c0_i32, %c0_i32_0 : i32, i32
  }
  func.func @transform_4(%arg0: i32) -> (i32, i32) {
    %c0_i32 = arith.constant 0 : i32
    %c0_i32_0 = arith.constant 0 : i32
    %c0_i32_1 = arith.constant 0 : i32
    return %c0_i32, %c0_i32_0 : i32, i32
  }
  func.func @transform_5(%arg0: i32) -> (i32, i32) {
    %c0_i32 = arith.constant 0 : i32
    %c0_i32_0 = arith.constant 0 : i32
    %c0_i32_1 = arith.constant 0 : i32
    return %c0_i32, %c0_i32_0 : i32, i32
  }
}

</mosaic_0001>

<bundles_post_ra>
// kernel: tpu_custom_call.1
= control target key start
LH: loop header
LB: loop body
LE: loop exit
PB: predicated region body
PF: predicated region fallthrough
CT: control target
= control target key end

     0   :  { %s448_s0 = inlined_call_operand.vmem [shape: f32[1,512], index: 0, kind: input, shape index: {}]   ;;  %s449_s1 = inlined_call_operand.vmem [shape: f32[32,8], index: 1, kind: input, shape index: {}]   ;;  %s450_s2 = inlined_call_operand.vmem [shape: f32[1,8], index: 2, kind: input, shape index: {}]   ;;  %s451_s3 = inlined_call_operand.vmem [shape: f32[8,32], index: 3, kind: input, shape index: {}]   ;;  %s452_s4 = inlined_call_operand.vmem [shape: f32[1,32], index: 4, kind: input, shape index: {}]   ;;  %s453_s5 = inlined_call_operand.hbm [shape: f32[1,512], index: 5, kind: output, shape index: {}]  }
   0x1   :  { %v397_v0 = vld [vmem:[%s448_s0] sm:$0xf] }
   0x2   :  { %10 = vsyncpa [#allocation3], 0  ;;  %s356_s20 = smov 96   ;;  %s357_s21 = smov 32   ;;  %v73_v1 = vld [vmem:[%s449_s1] sm:$0xff]  ;;  %v74_v2 = vld [vmem:[%s449_s1 + $0x8] sm:$0xff]  ;;  %v255_v56 = vlaneseq }
   0x3   :  { %24 = vrot.lane.b32.xlu0 %v397_v0, %s356_s20  ;;  %32 = vrot.lane.b32.xlu1 %v397_v0, %s357_s21  ;;  %s358_s22 = smov 64   ;;  %v315_v3 = vpack.c.bf16 %v74_v2, %v73_v1  ;;  %v359_v4 = vmov 0.0|0.0   ;;  %v75_v5 = vld [vmem:[%s449_s1 + $0x10] sm:$0xff]  ;;  %v76_v6 = vld [vmem:[%s449_s1 + $0x18] sm:$0xff]  ;;  %vm360_vm0 = vmmov 0   ;;  %v361_v8 = vmov 0.0  }
   0x4   :  { %314 = vmatprep.subr.bf16.mxu0 %v359_v4  ;;  %v318_v7 = vpack.c.bf16 %v76_v6, %v75_v5  ;;  %306 = vmatprep.mubr.msk.f32.mxu0 %vm360_vm0, %v361_v8  ;;  %v36_v14 = vrot.slane %v397_v0, 1  ;;  %v48_v22 = vrot.slane %v397_v0, 2  ;;  %v60_v30 = vrot.slane %v397_v0, 3  ;;  %v153_v40 = vld [vmem:[%s451_s3] sm:$0xff] }
   0x5   :  { %316 = vmatpush3.bf16.msra.mxu0 %v315_v3  ;;  %309 = vmatprep.subr.mxu1 %v361_v8  ;;  %vm78_vm1 = vcmask 261120   ;;  %v77_v41 = vld [vmem:[%s450_s2] sm:$0x1]  ;;  %vm155_vm2 = vcmask 64512   ;;  %v362_v54 = vmov 1966171168  }
   0x6   :  { %317 = vmatprep.subr.bf16.mxu0 %v359_v4  ;;  %311 = vmatprep.mubr.msk.f32.mxu1 %vm360_vm0, %v361_v8  ;;  %v154_v46 = vld [vmem:[%s452_s4] sm:$0x1]  ;;  %v253_v55 = vunpack.c.l.s4 %v362_v54  ;;  %v256_v59 = vshrl.u32 %v255_v56, 7  ;;  %vm246_vm3 = vcmask 523264   ;;  %vm248_vm4 = vcmask 785408   ;;  %s363_s2 = smov [#allocation2]  }
   0x7   :  { %28 = vrot.lane.b32.xlu0 %v397_v0, %s358_s22  ;;  %310 = vmatpush3.msra.mxu1 %v153_v40  ;;  %s280_s3 = sshll.u32 %s363_s2, 4  ;;  %vm271_vm5 = vcmp.lt.s32.totalorder %v255_v56, 512  ;;  %s281_s3 = int_to_ptr.vmem [resolvable:$true] %s280_s3 }
   0x8   :  { %v254_v58 = vunpack.c.0.s8 %v253_v55  ;;  %s332_s4 = scalar_lea.vmem %s281_s3, 64  ;;  %p337_p1 = scmp.lt.s32.totalorder %s281_s3, %s281_s3 }
   0x9   :  { %319 = vmatpush3.bf16.msra.mxu0 %v318_v7  ;;  %p333_p0 = scmp.ne.s32.totalorder %s281_s3, %s332_s4  ;;  %p338_p2 = scmp.lt.s32.totalorder %s332_s4, %s332_s4 }
   0xa   :  { %v257_v63 = vsub.s32 %v254_v58, %v256_v59 }
   0xb   :  { %p339_p3 = por %p338_p2, %p337_p1 }
   0xd   :  { %p340_p4 = pnand %p339_p3, %p333_p0 }
  0x75   :  { %v25_v9 = vpop.permute.xlu0 %24  ;;  %v33_v12 = vpop.permute.xlu1 %32 }
  0x76   :  { %v27_v10 = vadd.f32 %v25_v9, %v397_v0  ;;  %v39_v16 = vrot.slane %v25_v9, 1  ;;  %v45_v21 = vrot.slane %v33_v12, 1  ;;  %v51_v24 = vrot.slane %v25_v9, 2 }
  0x77   :  { %v57_v29 = vrot.slane %v33_v12, 2  ;;  %v63_v32 = vrot.slane %v25_v9, 3  ;;  %v69_v37 = vrot.slane %v33_v12, 3 }
  0x79   :  { %v29_v11 = vpop.permute.xlu0 %28 }
  0x7a   :  { %v31_v13 = vadd.f32 %v29_v11, %v27_v10  ;;  %v42_v18 = vrot.slane %v29_v11, 1  ;;  %v54_v26 = vrot.slane %v29_v11, 2  ;;  %v66_v34 = vrot.slane %v29_v11, 3 }
  0x7c   :  { %v35_v15 = vadd.f32 %v33_v12, %v31_v13 }
  0x7e   :  { %v38_v17 = vadd.f32 %v36_v14, %v35_v15 }
  0x80   :  { %v41_v19 = vadd.f32 %v39_v16, %v38_v17 }
  0x82   :  { %v44_v20 = vadd.f32 %v42_v18, %v41_v19 }
  0x84   :  { %v47_v23 = vadd.f32 %v45_v21, %v44_v20 }
  0x86   :  { %v50_v25 = vadd.f32 %v48_v22, %v47_v23 }
  0x88   :  { %v53_v27 = vadd.f32 %v51_v24, %v50_v25 }
  0x8a   :  { %v56_v28 = vadd.f32 %v54_v26, %v53_v27 }
  0x8c   :  { %v59_v31 = vadd.f32 %v57_v29, %v56_v28 }
  0x8e   :  { %v62_v33 = vadd.f32 %v60_v30, %v59_v31 }
  0x90   :  { %v65_v35 = vadd.f32 %v63_v32, %v62_v33 }
  0x92   :  { %v68_v36 = vadd.f32 %v66_v34, %v65_v35 }
  0x94   :  { %v71_v38 = vadd.f32 %v69_v37, %v68_v36 }
  0x96   :  { %v72_v39 = vmul.f32 0.0625, %v71_v38 }
  0x98   :  { %307 = vmatmul.mubr.msk.f32.vlgmr.msra.gmra.mrb[0].mxu0 %vm78_vm1, %v72_v39 }
 0x16b   :  { %v148_v42 = vpop.f32.mrb[0].mxu0 }
 0x16c   :  { %v149_v43 = vadd.f32 %v148_v42, %v77_v41  ;;  %v308_v44 = vpop.f32.mrb[1].mxu0 }
 0x16e   :  { %v152_v45 = vmax.f32 %v149_v43, 0.0 }
 0x170   :  { %312 = vmatmul.mubr.msk.f32.vlgmr.msra.gmra.mrb[0].mxu1 %vm155_vm2, %v152_v45 }
 0x243   :  { %v225_v47 = vpop.f32.mrb[0].mxu1 }
 0x244   :  { %v226_v48 = vadd.f32 %v225_v47, %v154_v46  ;;  %v313_v49 = vpop.f32.mrb[1].mxu1 }
 0x246   :  { %v290_v50 = vmul.f32 -1.442695, %v226_v48 }
 0x248   :  { %328 = vpow2.f32 %v290_v50 }
 0x252   :  { %v329_v51 = vpop.eup %328 }
 0x253   :  { %v232_v52 = vadd.f32 1.0, %v329_v51 }
 0x255   :  { %330 = vrcp.f32 %v232_v52 }
 0x25f   :  { %v331_v53 = vpop.eup %330 }
 0x260   :  { %239 = vrot.lane.b32.xlu0 %v331_v53, %s358_s22  ;;  %236 = vrot.lane.b32.xlu1 %v331_v53, %s357_s21 }
 0x264   :  { %242 = vrot.lane.b32.xlu1 %v331_v53, %s356_s20 }
 0x2d2   :  { %v237_v57 = vpop.permute.xlu1 %236  ;;  %v240_v60 = vpop.permute.xlu0 %239 }
 0x2d3   :  { %v245_v61 = vsel %vm78_vm1, %v331_v53, %v237_v57 }
 0x2d4   :  { %v247_v62 = vsel %vm246_vm3, %v245_v61, %v240_v60 }
 0x2d6   :  { %v243_v1 = vpop.permute.xlu1 %242 }
 0x2d7   :  { %v249_v2 = vsel %vm248_vm4, %v247_v62, %v243_v1 }
 0x2d8   :  { %v251_v3 = vcombine.low %v249_v2, %v249_v2 }
 0x2da   :  { %v258_v4 = vrot.slane %v251_v3, %v257_v63 }
 0x2dc   :  { %v259_v5 = vcombine.low %v258_v4, %v258_v4 }
 0x2de   :  { %v266_v6 = vrot.slane %v259_v5, %v257_v63 }
 0x2e0   :  { %v268_v7 = vmul.f32 %v266_v6, %v397_v0 }
 0x2e2   :  { %273 = vst.msk [vmem:[#allocation2] sm:$0xf] %vm271_vm5, %v268_v7 }
 0x2e3   :  { %343 = shalt.err (!%p340_p4)
}
 0x2e4   :  { %s344_s12 = scalar_lea.hbm %s453_s5, 64 }
 0x2e5   :  { %p345_p5 = scmp.ne.s32.totalorder %s453_s5, %s344_s12  ;;  %p348_p6 = scmp.lt.u32.totalorder %s344_s12, %s453_s5 }
 0x2e7   :  { %p350_p7 = pnand %p348_p6, %p345_p5 }
 0x2e9   :  { %353 = shalt.err (!%p350_p7)
}
 0x2ea   :  { %283 = dma.vmem_to_hbm [thread:$0]  %s281_s3, 64, %s453_s5, [#allocation3]  }
 0x2eb   :  { %354 = dma.done.wait [#allocation3], 64  }
 0x2ec   :  { %355 = vsyncadd [#allocation3], 4294967232 }
 0x2ed   :  { %287 = vsyncpa [#allocation3], 1 }

</bundles_post_ra>
